<compile_context>
chip_gen: v7x
topology: tpu7x:2x2x1
jax: 0.10.0
libtpu: 0.0.40
codegen_flags: <defaults>
</compile_context>

<pallas_src>
import jax
import jax.numpy as jnp
from jax.experimental import pallas as pl
from jax.experimental.pallas import tpu as pltpu

_LANES = 128                         # vreg lane width: keep last dim lane-dense
_TARGET_BLOCK_BYTES = 2 * 1024 * 1024  # ~2 MiB per operand per grid step
_MIN_PALLAS_BYTES = 128 * 1024         # below this, plain XLA fusion is faster
_VMEM_LIMIT_BYTES = 32 * 1024 * 1024   # fits v7x (64 MiB phys) / v6e / v5e


# ----------------------------------------------------------------------------
# Kernels
# ----------------------------------------------------------------------------
def _residual_add_kernel(fx_ref, x_ref, o_ref):
    # Pure VPU elementwise add on a lane-dense (block_rows, 128) tile.
    o_ref[...] = (fx_ref[...] + x_ref[...]).astype(o_ref.dtype)


def _make_fused_kernel(elementwise_fn):
    def _kernel(x_ref, o_ref):
        x = x_ref[...]
        # Explicit astype: elementwise_fn may promote internally (e.g. bf16->f32).
        o_ref[...] = (elementwise_fn(x) + x).astype(o_ref.dtype)
    return _kernel


# ----------------------------------------------------------------------------
# Tiling helpers
# ----------------------------------------------------------------------------
def _round_up(x, m):
    return -(-x // m) * m


def _sublane(dtype):
    # Min-tile sublane count per dtype width: (8,128) f32, (16,128) bf16, (32,128) int8.
    return {4: 8, 2: 16, 1: 32}.get(jnp.dtype(dtype).itemsize, 8)


def _plan(n, dtype, *, min_grid=4):
    """Pick (rows_padded, block_rows, grid) for a flat array of n elements."""
    itemsize = jnp.dtype(dtype).itemsize
    sub = _sublane(dtype)
    rows = -(-n // _LANES)                              # ceil(n / 128)
    rows_padded = _round_up(max(rows, 1), sub)          # min-tile only, not block-multiple

    # Byte-budgeted block: ~2 MiB of one operand per step (4096 rows f32 / 8192 bf16).
    block_rows = _round_up(max(_TARGET_BLOCK_BYTES // (_LANES * itemsize), sub), sub)
    block_rows = min(block_rows, rows_padded)

    # v7x has 2 TensorCores: keep several blocks on the "parallel" axis so both run.
    if rows_padded > sub and -(-rows_padded // block_rows) < min_grid:
        block_rows = max(sub, _round_up(-(-rows_padded // min_grid), sub))

    grid = -(-rows_padded // block_rows)                # ragged tail OK (masked writes)
    return rows_padded, block_rows, grid


def _to_2d(flat, rows_padded):
    n_padded = rows_padded * _LANES
    if flat.shape[0] != n_padded:                       # pad only when unavoidable
        flat = jnp.pad(flat, (0, n_padded - flat.shape[0]))
    return flat.reshape(rows_padded, _LANES)


def _from_2d(out2, n, orig_shape):
    if out2.size == n:                                  # aligned: free reshape, no slice
        return out2.reshape(orig_shape)
    return out2.reshape(-1)[:n].reshape(orig_shape)


# ----------------------------------------------------------------------------
# Wrappers
# ----------------------------------------------------------------------------
def residual_add(fx, x, *, min_pallas_bytes=_MIN_PALLAS_BYTES):
    """out = fx + x (PyTorch dtype promotion), tiled lane-dense Pallas add."""
    assert fx.shape == x.shape
    out_dtype = jnp.promote_types(fx.dtype, x.dtype)    # matches torch `fn(x) + x`
    n = x.size
    itemsize = jnp.dtype(out_dtype).itemsize

    # Small-tensor fast path: kernel launch + DMA setup would dominate.
    if n == 0 or n * itemsize < min_pallas_bytes:
        return fx.astype(out_dtype) + x.astype(out_dtype)

    orig_shape = x.shape
    rows_padded, block_rows, grid = _plan(n, out_dtype)
    fx2 = _to_2d(fx.reshape(-1).astype(out_dtype), rows_padded)
    x2 = _to_2d(x.reshape(-1).astype(out_dtype), rows_padded)

    spec = pl.BlockSpec((block_rows, _LANES), lambda i: (i, 0))
    cost = pl.CostEstimate(flops=n, transcendentals=0,
                           bytes_accessed=3 * n * itemsize)

    out2 = pl.pallas_call(
        _residual_add_kernel,
        out_shape=jax.ShapeDtypeStruct((rows_padded, _LANES), out_dtype),
        grid=(grid,),
        in_specs=[spec, spec],
        out_specs=spec,
        input_output_aliases={0: 0},                    # reuse fx buffer for the output
        compiler_params=pltpu.CompilerParams(
            dimension_semantics=("parallel",),          # shard blocks across TCs (v7x)
            vmem_limit_bytes=_VMEM_LIMIT_BYTES),
        cost_estimate=cost,
    )(fx2, x2)
    return _from_2d(out2, n, orig_shape)


def residual_fused_elementwise(elementwise_fn, x, *,
                               min_pallas_bytes=_MIN_PALLAS_BYTES,
                               transcendentals_per_element=1,
                               flops_per_element=8):
    """out = elementwise_fn(x) + x with fn fused into the same pallas_call."""
    orig_shape, dtype = x.shape, x.dtype
    n = x.size
    itemsize = jnp.dtype(dtype).itemsize

    if n == 0 or n * itemsize < min_pallas_bytes:
        return (elementwise_fn(x) + x).astype(dtype)

    rows_padded, block_rows, grid = _plan(n, dtype)
    x2 = _to_2d(x.reshape(-1), rows_padded)

    spec = pl.BlockSpec((block_rows, _LANES), lambda i: (i, 0))
    cost = pl.CostEstimate(flops=flops_per_element * n,
                           transcendentals=transcendentals_per_element * n,
                           bytes_accessed=2 * n * itemsize)

    out2 = pl.pallas_call(
        _make_fused_kernel(elementwise_fn),
        out_shape=jax.ShapeDtypeStruct((rows_padded, _LANES), dtype),
        grid=(grid,),
        in_specs=[spec],
        out_specs=spec,
        input_output_aliases={0: 0},                    # reuse x buffer for the output
        compiler_params=pltpu.CompilerParams(
            dimension_semantics=("parallel",),
            vmem_limit_bytes=_VMEM_LIMIT_BYTES),
        cost_estimate=cost,
    )(x2)
    return _from_2d(out2, n, orig_shape)


def residual(fn, x, *args, **kwargs):
    """Pallas equivalent of Residual.forward: fn(x, *args, **kwargs) + x."""
    # TODO(synk): when `fn` is itself a Pallas kernel (attention / conv block),
    # the `+ x` should be fused into that kernel's epilogue instead (2n vs 3n
    # HBM bytes); here fn is opaque so only the residual add runs in Pallas.
    fx = fn(x, *args, **kwargs)
    return residual_add(fx, x)


# ----------------------------------------------------------------------------
# Demo / correctness check
# ----------------------------------------------------------------------------
if __name__ == "__main__":
    key = jax.random.PRNGKey(0)
    fn = jax.nn.gelu   # stand-in for the wrapped block; elementwise so both paths test

    # 1. Small tensor consistent with the module -> fast path (pure XLA fusion).
    x_small = jax.random.normal(key, (2, 4, 16, 16), dtype=jnp.float32)
    out_small = residual(fn, x_small)
    ref_small = fn(x_small) + x_small

    # 2. Medium tensor -> Pallas residual-add path (grid of 4 blocks).
    k2 = jax.random.fold_in(key, 1)
    x_med = jax.random.normal(k2, (2, 8, 64, 64), dtype=jnp.float32)
    out_med = residual(fn, x_med)
    ref_med = fn(x_med) + x_med

    # 3. Same medium tensor through the fused-elementwise Pallas path.
    out_fused = residual_fused_elementwise(fn, x_med)

    # 4. Unaligned shape, forced through the Pallas add (pad + slice path).
    k3 = jax.random.fold_in(key, 2)
    x_odd = jax.random.normal(k3, (3, 5, 17, 13), dtype=jnp.float32)
    out_odd = residual_add(fn(x_odd), x_odd, min_pallas_bytes=0)
    ref_odd = fn(x_odd) + x_odd

    jax.block_until_ready((out_small, out_med, out_fused, out_odd))

    assert out_small.shape == x_small.shape and out_small.dtype == ref_small.dtype
    assert out_med.shape == x_med.shape and out_med.dtype == ref_med.dtype
    assert out_fused.shape == x_med.shape
    assert out_odd.shape == x_odd.shape
    assert jnp.allclose(out_small, ref_small, atol=1e-4, rtol=1e-4), "small path mismatch"
    assert jnp.allclose(out_med, ref_med, atol=1e-4, rtol=1e-4), "general path mismatch"
    assert jnp.allclose(out_fused, ref_med, atol=1e-4, rtol=1e-4), "fused path mismatch"
    assert jnp.allclose(out_odd, ref_odd, atol=1e-4, rtol=1e-4), "unaligned path mismatch"

    print("KERNEL_OK")
</pallas_src>

<mosaic_0001>
module attributes {stable_mosaic.version = 11 : i64} {
  func.func @_residual_add_kernel(%arg0: i32, %arg1: memref<128x128xf32, #tpu.memory_space<vmem>>, %arg2: memref<128x128xf32, #tpu.memory_space<vmem>>, %arg3: memref<128x128xf32, #tpu.memory_space<vmem>>) attributes {dimension_semantics = [#tpu.dimension_semantics<parallel>], iteration_bounds = array<i64: 4>, scalar_prefetch = 0 : i64, scratch_operands = 0 : i64, tpu.core_type = #tpu.core_type<tc>, window_params = [{transform_indices = @transform_0, window_bounds = array<i64: 128, 128>}, {transform_indices = @transform_1, window_bounds = array<i64: 128, 128>}, {transform_indices = @transform_2, window_bounds = array<i64: 128, 128>}]} {
    %c0 = arith.constant 0 : index
    %c0_0 = arith.constant 0 : index
    %0 = vector.load %arg1[%c0, %c0_0] : memref<128x128xf32, #tpu.memory_space<vmem>>, vector<128x128xf32>
    %c0_1 = arith.constant 0 : index
    %c0_2 = arith.constant 0 : index
    %1 = vector.load %arg2[%c0_1, %c0_2] : memref<128x128xf32, #tpu.memory_space<vmem>>, vector<128x128xf32>
    %2 = arith.addf %0, %1 : vector<128x128xf32>
    %c0_3 = arith.constant 0 : index
    %c0_4 = arith.constant 0 : index
    %3 = vector.load %arg3[%c0_3, %c0_4] : memref<128x128xf32, #tpu.memory_space<vmem>>, vector<128x128xf32>
    tpu.vector_store %arg3[%c0_3, %c0_4], %2 {strides = array<i32>} : memref<128x128xf32, #tpu.memory_space<vmem>>, vector<128x128xf32>,
    return
  }
  func.func @transform_0(%arg0: i32) -> (i32, i32) {
    %c0_i32 = arith.constant 0 : i32
    %c0_i32_0 = arith.constant 0 : i32
    return %arg0, %c0_i32 : i32, i32
  }
  func.func @transform_1(%arg0: i32) -> (i32, i32) {
    %c0_i32 = arith.constant 0 : i32
    %c0_i32_0 = arith.constant 0 : i32
    return %arg0, %c0_i32 : i32, i32
  }
  func.func @transform_2(%arg0: i32) -> (i32, i32) {
    %c0_i32 = arith.constant 0 : i32
    %c0_i32_0 = arith.constant 0 : i32
    return %arg0, %c0_i32 : i32, i32
  }
}

</mosaic_0001>

<bundles_post_ra>
// kernel: tpu_custom_call.1
= control target key start
LH: loop header
LB: loop body
LE: loop exit
PB: predicated region body
PF: predicated region fallthrough
CT: control target
= control target key end

     0   :  { %7 = vsyncpa [#allocation3], 0  ;;  %s755_s0 = inlined_call_operand.hbm [shape: f32[512,128], index: 0, kind: input, shape index: {}, may-alias: {0,2}]   ;;  %s756_s1 = inlined_call_operand.vmem [shape: f32[512,128], index: 1, kind: input, shape index: {}]   ;;  %s757_s2 = inlined_call_operand.hbm [shape: f32[512,128], index: 2, kind: output, shape index: {}, may-alias: {0,2}]  }
   0x1   :  { %9 = vsyncpa [#allocation3 + $0x1], 0 }
   0x2   :  { %10 = vsyncpa [#allocation4], 0 }
   0x3   :  { %12 = vsyncpa [#allocation4 + $0x1], 0  ;;  %s536_s9 = smov 0   ;;  %s538_s10 = smov 0  }
   0x4   :  { %s540_s11 = smov 0   ;;  %s542_s12 = smov 0  }
   0x5 LB: > { %s557_s13 = sadd.s32 4294967295, %s513_s12   ;;  %s349_s14 = sadd.s32 4294967294, %s513_s12   ;;  %s513_s12 = sphi %s542_s12, %s769_s12   ;;  %s509_s11 = sphi %s540_s11, %s768_s11   ;;  %s505_s10 = sphi %s538_s10, %s767_s10   ;;  %s501_s9 = sphi %s536_s9, %s766_s9  }
   0x6   : > { %s561_s15 = sadd.s32 1, %s513_s12   ;;  %s25_s16 = sadd.s32 1, %s509_s11 }
   0x7   : > { %s22_s17 = ssub.s32 %s513_s12, %s561_s15  ;;  %p32_p0 = scmp.ne.s32.totalorder %s509_s11, %s505_s10 }
   0x8   : > { %p23_p1 = scmp.eq.s32.totalorder %s22_s17, 0  ;;  %p33_p2 = scmp.eq.s32.totalorder %s513_s12, 0 }
   0x9   : > { %p38_p3 = scmp.ne.s32.totalorder %s505_s10, %s501_s9  ;;  %p39_p4 = scmp.eq.s32.totalorder %s557_s13, 0 }
   0xa   : > { %s573_s18 = scalar_select %p23_p1, %s509_s11, %s25_s16  }
   0xb   : > { %p575_p5 = por %p33_p2, %p32_p0  ;;  %p579_p6 = por %p39_p4, %p38_p3 }
   0xc   : > { %p88_p7 = scmp.eq.s32.totalorder %s557_s13, 3  ;;  %p94_p8 = scmp.eq.s32.totalorder %s349_s14, 3 }
   0xd   : > { %p379_p9 = scmp.lt.s32.totalorder %s513_s12, 4  ;;  %s114_s23 = sand.u32 1, %s509_s11  }
   0xe   : > { %p585_p10 = por %p88_p7, %p32_p0  ;;  %p589_p11 = por %p94_p8, %p38_p3 }
   0xf   : > { %s365_s24 = sshll.u32 %s513_s12, 11  ;;  %s352_s25 = sshll.u32 %s114_s23, 7 }
  0x10   : > { %s761_s21 = scalar_select %p585_p10, 1, 0 }
  0x11   : > { %s762_s22 = scalar_select %p589_p11, 1, 0 }
  0x12   : > { %s598_s28 = scalar_lea.hbm %s755_s0, %s365_s24  ;;  %s118_s29 = scalar_lea.vmem [#allocation2], %s352_s25 }
  0x13   : > { %s125_s30 = sshll.u32 %s118_s29, 4  ;;  %p602_p12 = pnand %p379_p9, %p575_p5  ;;  %s606_s30 = int_to_ptr.vmem [resolvable:$true] %s125_s30 }
  0x14   : > { %s608_s4 = scalar_lea.sflag [#allocation3], %s114_s23  ;;  %s417_s5 = scalar_lea.hbm %s598_s28, 2048 }
  0x15   : > { %p418_p13 = scmp.ne.s32.totalorder %s598_s28, %s417_s5  ;;  %p419_p0 = pneg %p602_p12 }
  0x16   : > { %s422_s8 = scalar_lea.hbm %s755_s0, 8192  ;;  %p423_p3 = scmp.lt.u32.totalorder %s598_s28, %s755_s0 }
  0x17   : > { %p420_p1 = pnand %p419_p0, %p418_p13  ;;  %p424_p4 = scmp.lt.u32.totalorder %s422_s8, %s417_s5 }
  0x18   : > { %p426_p7 = scmp.lt.u32.totalorder %s417_s5, %s598_s28 }
  0x19   : > { %p421_p2 = pneg %p420_p1  ;;  %p425_p5 = por %p424_p4, %p423_p3 }
  0x1b   : > { %p427_p8 = por %p426_p7, %p425_p5 }
  0x1d   : > { %p428_p9 = pnand %p427_p8, %p421_p2 }
  0x1f   : > { %431 = shalt.err (!%p428_p9)
}
  0x20   : > { %s432_s17 = scalar_lea.vmem %s606_s30, 2048  ;;  %s515_s19 = smov [#allocation2]  }
  0x21   : > { %p433_p13 = scmp.ne.s32.totalorder %s606_s30, %s432_s17  ;;  %s437_s23 = sshll.u32 %s515_s19, 4  ;;  %s438_s23 = int_to_ptr.vmem [resolvable:$false] %s437_s23 }
  0x22   : > { %s439_s24 = scalar_lea.vmem %s438_s23, 4096  ;;  %p440_p10 = scmp.lt.s32.totalorder %s606_s30, %s438_s23 }
  0x23   : > { %p435_p1 = pnand %p433_p13, %p419_p0  ;;  %p441_p3 = scmp.lt.s32.totalorder %s439_s24, %s432_s17 }
  0x25   : > { %p436_p11 = pneg %p435_p1  ;;  %p442_p4 = por %p441_p3, %p440_p10 }
  0x27   : > { %p443_p5 = pnand %p442_p4, %p436_p11 }
  0x29   : > { %446 = shalt.err (!%p443_p5)
}
  0x2a   : > { %s516_s25 = smov 128   ;;  %s517_s26 = smov 8  }
  0x2b   : > { %374 = dma.hbm_to_vmem [thread:$0]  (!%p602_p12), %s598_s28, 2048, %s606_s30, %s608_s4, %s516_s25, %s516_s25, %s517_s26  }
  0x2c   : > { %p355_p0 = scmp.ge.s32.totalorder %s513_s12, 1  ;;  %p142_p2 = scmp.lt.s32.totalorder %s513_s12, 5 }
  0x2e   : > { %p143_p7 = pnand %p355_p0, %p142_p2 }
  0x2f   : > { %s639_s27 = sand.u32 (!%p143_p7), 1, %s505_s10  }
  0x30   : > { %146 = sbr.rel (%p143_p7) target bundleno = 87 (0x57), region = 28  ;;  %s356_s29 = sshll.u32 (!%p143_p7), %s639_s27, 7 }
  0x31   : > { %s149_s5 = scalar_lea.sflag (!%p143_p7), [#allocation3], %s639_s27  ;;  %s643_s6 = scalar_lea.vmem (!%p143_p7), [#allocation2], %s356_s29 }
  0x37   : > { %492 = dma.done.wait (%p579_p6), %s149_s5, 2048  }
  0x38   : > { %494 = vsyncadd (%p579_p6), %s149_s5, 4294965248  ;;  %s358_s28 = sshll.u32 %s557_s13, 4  ;;  %v186_v0 = vld [vmem:[%s643_s6] sm:$0xff]  ;;  %v187_v2 = vld [vmem:[%s643_s6 + $0x8] sm:$0xff]  ;;  %s664_s20 = scalar_lea.vmem [#allocation5], %s356_s29 }
  0x39   : > { %p180_p10 = scmp.lt.s32.totalorder %s358_s28, 63  ;;  %v188_v5 = vld [vmem:[%s643_s6 + $0x10] sm:$0xff]  ;;  %v189_v9 = vld [vmem:[%s643_s6 + $0x18] sm:$0xff]  ;;  %v190_v11 = vld [vmem:[%s643_s6 + $0x20] sm:$0xff]  ;;  %s366_s8 = sshll.u32 %s557_s13, 11 }
  0x3a   : > { %v191_v14 = vld [vmem:[%s643_s6 + $0x28] sm:$0xff]  ;;  %v192_v18 = vld [vmem:[%s643_s6 + $0x30] sm:$0xff]  ;;  %v193_v20 = vld [vmem:[%s643_s6 + $0x38] sm:$0xff]  ;;  %s264_s14 = sshll.u32 %s664_s20, 4  ;;  %s706_s17 = scalar_lea.hbm %s757_s2, %s366_s8  ;;  %s708_s14 = int_to_ptr.vmem [resolvable:$true] %s264_s14 }
  0x3b   : > { %s771_s28 = smov (!%p180_p10, %s358_s28), 63  ;;  %v194_v23 = vld [vmem:[%s643_s6 + $0x40] sm:$0xff]  ;;  %v195_v27 = vld [vmem:[%s643_s6 + $0x48] sm:$0xff]  ;;  %v196_v29 = vld [vmem:[%s643_s6 + $0x50] sm:$0xff]  ;;  %s251_s19 = scalar_lea.sflag [#allocation4], %s639_s27 }
  0x3c   : > { %s359_s30 = sshll.u32 %s771_s28, 3  ;;  %v197_v32 = vld [vmem:[%s643_s6 + $0x58] sm:$0xff]  ;;  %v198_v36 = vld [vmem:[%s643_s6 + $0x60] sm:$0xff]  ;;  %v199_v38 = vld [vmem:[%s643_s6 + $0x68] sm:$0xff]  ;;  %s447_s23 = scalar_lea.vmem %s708_s14, 2048 }
  0x3d   : > { %s653_s7 = scalar_lea.vmem %s756_s1, %s359_s30  ;;  %v200_v41 = vld [vmem:[%s643_s6 + $0x70] sm:$0xff]  ;;  %v201_v45 = vld [vmem:[%s643_s6 + $0x78] sm:$0xff]  ;;  %p448_p6 = scmp.ne.s32.totalorder %s708_s14, %s447_s23 }
  0x3e   : > { %v202_v1 = vld [vmem:[%s653_s7] sm:$0xff]  ;;  %v203_v4 = vld [vmem:[%s653_s7 + $0x8] sm:$0xff]  ;;  %v204_v6 = vld [vmem:[%s653_s7 + $0x10] sm:$0xff]  ;;  %p764_p11 = scmp.ne.s32.totalorder %s761_s21, 0  ;;  %s518_s24 = smov [#allocation5]  }
  0x3f   : > { %v218_v3 = vadd.f32 %v202_v1, %v186_v0  ;;  %v219_v7 = vadd.f32 %v203_v4, %v187_v2  ;;  %v220_v8 = vadd.f32 %v204_v6, %v188_v5  ;;  %v205_v10 = vld [vmem:[%s653_s7 + $0x18] sm:$0xff]  ;;  %v206_v13 = vld [vmem:[%s653_s7 + $0x20] sm:$0xff]  ;;  %v207_v15 = vld [vmem:[%s653_s7 + $0x28] sm:$0xff]  ;;  %s451_s25 = sshll.u32 %s518_s24, 4  ;;  %s452_s25 = int_to_ptr.vmem [resolvable:$false] %s451_s25 }
  0x40   : > { %v221_v12 = vadd.f32 %v205_v10, %v189_v9  ;;  %v222_v16 = vadd.f32 %v206_v13, %v190_v11  ;;  %v223_v17 = vadd.f32 %v207_v15, %v191_v14  ;;  %v208_v19 = vld [vmem:[%s653_s7 + $0x30] sm:$0xff]  ;;  %v209_v22 = vld [vmem:[%s653_s7 + $0x38] sm:$0xff]  ;;  %v210_v24 = vld [vmem:[%s653_s7 + $0x40] sm:$0xff]  ;;  %p449_p12 = pnand %p448_p6, %p764_p11  ;;  %s453_s26 = scalar_lea.vmem %s452_s25, 4096 }
  0x41   : > { %234 = vst [vmem:[%s664_s20] sm:$0xff] %v218_v3  ;;  %235 = vst [vmem:[%s664_s20 + $0x8] sm:$0xff] %v219_v7  ;;  %v224_v21 = vadd.f32 %v208_v19, %v192_v18  ;;  %v225_v25 = vadd.f32 %v209_v22, %v193_v20  ;;  %v226_v26 = vadd.f32 %v210_v24, %v194_v23  ;;  %v211_v28 = vld [vmem:[%s653_s7 + $0x48] sm:$0xff]  ;;  %v212_v31 = vld [vmem:[%s653_s7 + $0x50] sm:$0xff]  ;;  %p454_p9 = scmp.lt.s32.totalorder %s708_s14, %s452_s25  ;;  %p455_p13 = scmp.lt.s32.totalorder %s453_s26, %s447_s23 }
  0x42   : > { %236 = vst [vmem:[%s664_s20 + $0x10] sm:$0xff] %v220_v8  ;;  %237 = vst [vmem:[%s664_s20 + $0x18] sm:$0xff] %v221_v12  ;;  %v227_v30 = vadd.f32 %v211_v28, %v195_v27  ;;  %v213_v33 = vld [vmem:[%s653_s7 + $0x58] sm:$0xff]  ;;  %v228_v34 = vadd.f32 %v212_v31, %v196_v29  ;;  %v214_v37 = vld [vmem:[%s653_s7 + $0x60] sm:$0xff]  ;;  %p450_p8 = pneg %p449_p12 }
  0x43   : > { %238 = vst [vmem:[%s664_s20 + $0x20] sm:$0xff] %v222_v16  ;;  %239 = vst [vmem:[%s664_s20 + $0x28] sm:$0xff] %v223_v17  ;;  %v229_v35 = vadd.f32 %v213_v33, %v197_v32  ;;  %v230_v39 = vadd.f32 %v214_v37, %v198_v36  ;;  %v215_v40 = vld [vmem:[%s653_s7 + $0x68] sm:$0xff]  ;;  %v216_v42 = vld [vmem:[%s653_s7 + $0x70] sm:$0xff]  ;;  %p456_p1 = por %p455_p13, %p454_p9 }
  0x44   : > { %240 = vst [vmem:[%s664_s20 + $0x30] sm:$0xff] %v224_v21  ;;  %241 = vst [vmem:[%s664_s20 + $0x38] sm:$0xff] %v225_v25  ;;  %v231_v43 = vadd.f32 %v215_v40, %v199_v38  ;;  %v232_v44 = vadd.f32 %v216_v42, %v200_v41  ;;  %v217_v46 = vld [vmem:[%s653_s7 + $0x78] sm:$0xff] }
  0x45   : > { %242 = vst [vmem:[%s664_s20 + $0x40] sm:$0xff] %v226_v26  ;;  %243 = vst [vmem:[%s664_s20 + $0x48] sm:$0xff] %v227_v30  ;;  %v233_v47 = vadd.f32 %v217_v46, %v201_v45  ;;  %p457_p3 = pnand %p456_p1, %p450_p8 }
  0x46   : > { %244 = vst [vmem:[%s664_s20 + $0x50] sm:$0xff] %v228_v34  ;;  %245 = vst [vmem:[%s664_s20 + $0x58] sm:$0xff] %v229_v35 }
  0x47   : > { %246 = vst [vmem:[%s664_s20 + $0x60] sm:$0xff] %v230_v39  ;;  %247 = vst [vmem:[%s664_s20 + $0x68] sm:$0xff] %v231_v43 }
  0x48   : > { %248 = vst [vmem:[%s664_s20 + $0x70] sm:$0xff] %v232_v44  ;;  %249 = vst [vmem:[%s664_s20 + $0x78] sm:$0xff] %v233_v47 }
  0x49   : > { %460 = shalt.err (!%p457_p3)
}
  0x4a   : > { %s461_s29 = scalar_lea.hbm %s706_s17, 2048  ;;  %s465_s28 = scalar_lea.hbm %s757_s2, 8192 }
  0x4b   : > { %p462_p4 = scmp.ne.s32.totalorder %s706_s17, %s461_s29  ;;  %p466_p2 = scmp.lt.u32.totalorder %s706_s17, %s757_s2 }
  0x4c   : > { %p467_p7 = scmp.lt.u32.totalorder %s465_s28, %s461_s29  ;;  %p469_p6 = scmp.lt.u32.totalorder %s461_s29, %s706_s17 }
  0x4d   : > { %p463_p5 = pnand %p462_p4, %p764_p11 }
  0x4e   : > { %p468_p10 = por %p467_p7, %p466_p2 }
  0x4f   : > { %p464_p0 = pneg %p463_p5 }
  0x50   : > { %p470_p12 = por %p469_p6, %p468_p10 }
  0x52   : > { %p471_p8 = pnand %p470_p12, %p464_p0 }
  0x54   : > { %474 = shalt.err (!%p471_p8)
}
  0x55   : > { %s519_s4 = smov 128   ;;  %s520_s7 = smov 8  }
  0x56   : > { %369 = dma.vmem_to_hbm [thread:$0]  (%p764_p11), %s708_s14, 2048, %s706_s17, %s251_s19, %s519_s4, %s519_s4, %s520_s7  }
  0x57 PF: > { %p380_p9 = scmp.ge.s32.totalorder %s513_s12, 2  ;;  %s279_s20 = sand.u32 1, %s501_s9  }
  0x58   : > { %p765_p13 = scmp.ne.s32.totalorder %s762_s22, 0  ;;  %s280_s8 = scalar_lea.sflag [#allocation4], %s279_s20 }
  0x5a   : > { %p376_p1 = pnand %p380_p9, %p765_p13 }
  0x5c   : > { %496 = dma.done.wait (!%p376_p1), %s280_s8, 2048  }
  0x5d   : > { %498 = vsyncadd (!%p376_p1), %s280_s8, 4294965248  ;;  %p15_p3 = scmp.ge.s32.totalorder %s561_s15, 6   ;;  %s766_s9 = smov %s505_s10 }
  0x5e   : > { %s767_s10 = smov %s509_s11  ;;  %s768_s11 = smov %s573_s18 }
  0x5f   : > { %s769_s12 = smov %s561_s15  ;;  %17 = sbr.rel (!%p15_p3) target bundleno = 5 (0x5), region = 76 }
  0x66   :  { %285 = vsyncpa [#allocation3], 1 }
  0x67   :  { %287 = vsyncpa [#allocation3 + $0x1], 1 }
  0x68   :  { %288 = vsyncpa [#allocation4], 1 }
  0x69   :  { %290 = vsyncpa [#allocation4 + $0x1], 1 }

</bundles_post_ra>
